<compile_context>
chip_gen: v5e
topology: v5e:2x2
jax: 0.10.0
libtpu: 0.0.40
codegen_flags: <defaults>
</compile_context>

<pallas_src>
import functools
import math

import jax
import jax.numpy as jnp
from jax.experimental import pallas as pl
from jax.experimental.pallas import tpu as pltpu


def _round_up(x, m):
    return ((x + m - 1) // m) * m


def _pad_feature(d):
    # 256-alignment fills the 2x256x256 MXU on v6e/v7x for wide layers;
    # 128 is enough for narrow layers and for v5e's 128x128 MXU.
    return _round_up(d, 256) if d >= 256 else _round_up(d, 128)


def _fused_mlp_kernel(*refs, num_layers):
    # refs = (x_ref, w0, b0, w1, b1, ..., w{L-1}, b{L-1}, o_ref)
    x_ref, o_ref = refs[0], refs[-1]
    layer_refs = refs[1:-1]

    h = x_ref[...]                                       # bf16 (tm, K0_pad)
    for i in range(num_layers):                          # unrolled at trace time
        w_ref = layer_refs[2 * i]
        b_ref = layer_refs[2 * i + 1]
        acc = jnp.dot(h, w_ref[...],
                      preferred_element_type=jnp.float32)   # MXU, f32 acc
        acc = acc + b_ref[...]                               # f32 bias (row bcast)
        if i < num_layers - 1:
            # ReLU, then immediately narrow to bf16: halves the live intermediate
            # between layers (less vreg/VMEM pressure at large tm).
            h = jnp.maximum(acc, 0.0).astype(w_ref.dtype)
        else:
            h = acc
    o_ref[...] = h.astype(o_ref.dtype)                   # bf16 lane-dense store


@functools.partial(jax.jit, static_argnames=("output_dim",))
def _mlp_forward(x, weights, biases, *, output_dim):
    num_layers = len(weights)
    M, K = x.shape
    param_dtype = weights[0].dtype
    p_bytes = jnp.dtype(param_dtype).itemsize
    k0_pad = weights[0].shape[0]
    nl_pad = weights[-1].shape[1]
    max_feat = max(w.shape[1] for w in weights)

    # Lane-align the input features (no batch padding: the grid uses cdiv and the
    # boundary tile is masked by Pallas).
    xb = x.astype(param_dtype)
    if K < k0_pad:
        xb = jnp.pad(xb, ((0, 0), (0, k0_pad - K)))

    # ---- VMEM budget -> batch tile ------------------------------------------
    resident = (sum(int(w.size) * p_bytes for w in weights)      # Buffered(1)
                + sum(int(b.size) * 4 for b in biases))
    try:
        vmem_cap = int(pltpu.get_tpu_info().vmem_capacity_bytes)
    except Exception:
        vmem_cap = 64 * 1024 * 1024        # conservative (v7x per-core) fallback
    vmem_target = vmem_cap - (8 << 20)     # leave headroom for the compiler

    per_row = (2 * k0_pad * p_bytes        # double-buffered bf16 input tile
               + 2 * nl_pad * p_bytes      # double-buffered bf16 output tile
               + 2 * max_feat * 4)         # live f32 intermediates
    avail = max(vmem_target - resident, 1 << 20)
    tm = min(1024, max(16, (avail // per_row) // 16 * 16))
    tm = min(tm, _round_up(M, 16))         # 16-row multiple: full bf16 vreg packing
    if M >= 512:
        # Keep >= 2 grid steps so both v7x TensorCores get work on large batches.
        tm = min(tm, _round_up(pl.cdiv(M, 2), 16))
    tm = max(tm, 16)

    grid = (pl.cdiv(M, tm),)

    vmem_est = resident + tm * per_row
    vmem_limit = None
    if vmem_est > (16 << 20):
        vmem_limit = min(int(vmem_est * 3 // 2), vmem_target)
        vmem_limit = min(max(vmem_limit, vmem_est), vmem_cap - (4 << 20))
    # TODO(synk): add a per-layer K/N-tiled weight-streaming fallback
    # (pltpu.emit_pipeline or an extra grid axis) for widths where the resident
    # weights exceed the VMEM budget (hits first on v7x's 64 MiB per core).

    in_specs = [pl.BlockSpec((tm, k0_pad), lambda i: (i, 0))]
    operands = [xb]
    for w, b in zip(weights, biases):
        # Whole-array resident blocks; constant index_map -> single buffer.
        in_specs.append(pl.BlockSpec(w.shape, lambda i: (0, 0),
                                     pipeline_mode=pl.Buffered(1)))
        in_specs.append(pl.BlockSpec(b.shape, lambda i: (0, 0),
                                     pipeline_mode=pl.Buffered(1)))
        operands.append(w)
        operands.append(b)
    out_specs = pl.BlockSpec((tm, nl_pad), lambda i: (i, 0))

    flops = 2 * M * sum(w.shape[0] * w.shape[1] for w in weights)
    bytes_accessed = M * k0_pad * p_bytes + resident + M * nl_pad * p_bytes
    cost = pl.CostEstimate(flops=flops, transcendentals=0,
                           bytes_accessed=bytes_accessed)

    kernel = functools.partial(_fused_mlp_kernel, num_layers=num_layers)
    out = pl.pallas_call(
        kernel,
        out_shape=jax.ShapeDtypeStruct((M, nl_pad), param_dtype),   # bf16 writeback
        grid_spec=pltpu.PrefetchScalarGridSpec(
            num_scalar_prefetch=0,
            grid=grid,
            in_specs=in_specs,
            out_specs=out_specs,
        ),
        compiler_params=pltpu.CompilerParams(
            dimension_semantics=("parallel",),
            vmem_limit_bytes=vmem_limit,
        ),
        cost_estimate=cost,
    )(*operands)

    # Slice off the lane padding; return in the caller's dtype (nn.Linear semantics).
    return out[:, :output_dim].astype(x.dtype)


class MLPPallas:
    """Mirror of the PyTorch MLP: num_layers Linear layers, ReLU on all but last."""

    def __init__(self, input_dim, hidden_dim, output_dim, num_layers, key,
                 param_dtype=jnp.bfloat16):
        self.num_layers = num_layers
        self.input_dim = input_dim
        self.output_dim = output_dim
        self.param_dtype = param_dtype

        h = [hidden_dim] * (num_layers - 1)
        dims_in = [input_dim] + h
        dims_out = h + [output_dim]

        self.weights = []        # padded, bf16, shape (in_pad, out_pad)
        self.biases = []         # padded, f32, shape (1, out_pad)
        self.params_f32 = []     # unpadded f32 (for reference checks)
        for n, k in zip(dims_in, dims_out):
            key, kw, kb = jax.random.split(key, 3)
            # PyTorch nn.Linear default init: U(-1/sqrt(in), 1/sqrt(in))
            bound = 1.0 / math.sqrt(n)
            w = jax.random.uniform(kw, (n, k), jnp.float32, -bound, bound)
            b = jax.random.uniform(kb, (k,), jnp.float32, -bound, bound)
            self.params_f32.append((w, b))

            n_pad, k_pad = _pad_feature(n), _pad_feature(k)
            w_pad = jnp.zeros((n_pad, k_pad), param_dtype).at[:n, :k].set(
                w.astype(param_dtype))
            b_pad = jnp.zeros((1, k_pad), jnp.float32).at[0, :k].set(b)
            self.weights.append(w_pad)
            self.biases.append(b_pad)

    def __call__(self, x):
        assert x.ndim == 2 and x.shape[1] == self.input_dim
        return _mlp_forward(x, tuple(self.weights), tuple(self.biases),
                            output_dim=self.output_dim)


def mlp_reference(params_f32, x, param_dtype=jnp.bfloat16):
    """Same numerics as the kernel: bf16 operands / inter-layer acts / output,
    f32 accumulation and bias."""
    num_layers = len(params_f32)
    h = x.astype(param_dtype)
    for i, (w, b) in enumerate(params_f32):
        h = jnp.dot(h, w.astype(param_dtype),
                    preferred_element_type=jnp.float32) + b
        if i < num_layers - 1:
            h = jnp.maximum(h, 0.0).astype(param_dtype)
    return h.astype(param_dtype).astype(jnp.float32)


if __name__ == "__main__":
    key = jax.random.PRNGKey(0)
    key, kx, kp = jax.random.split(key, 3)

    batch, input_dim, hidden_dim, output_dim, num_layers = 8, 32, 32, 16, 3
    x = jax.random.normal(kx, (batch, input_dim), jnp.float32)

    model = MLPPallas(input_dim, hidden_dim, output_dim, num_layers, kp)
    out = jax.block_until_ready(model(x))

    ref = mlp_reference(model.params_f32, x, model.param_dtype)

    assert out.shape == (batch, output_dim), out.shape
    assert out.dtype == x.dtype
    err = float(jnp.max(jnp.abs(out - ref)))
    assert jnp.allclose(out, ref, atol=2e-2, rtol=2e-2), f"max abs err {err}"

    print("KERNEL_OK")
</pallas_src>

<mosaic_0001>
module attributes {stable_mosaic.version = 11 : i64} {
  func.func @_fused_mlp_kernel(%arg0: i32, %arg1: memref<16x128xbf16, #tpu.memory_space<vmem>>, %arg2: memref<128x128xbf16, #tpu.memory_space<vmem>>, %arg3: memref<1x128xf32, #tpu.memory_space<vmem>>, %arg4: memref<128x128xbf16, #tpu.memory_space<vmem>>, %arg5: memref<1x128xf32, #tpu.memory_space<vmem>>, %arg6: memref<128x128xbf16, #tpu.memory_space<vmem>>, %arg7: memref<1x128xf32, #tpu.memory_space<vmem>>, %arg8: memref<16x128xbf16, #tpu.memory_space<vmem>>) attributes {dimension_semantics = [#tpu.dimension_semantics<parallel>], iteration_bounds = array<i64: 1>, scalar_prefetch = 0 : i64, scratch_operands = 0 : i64, tpu.core_type = #tpu.core_type<tc>, window_params = [{transform_indices = @transform_0, window_bounds = array<i64: 16, 128>}, {pipeline_mode = #tpu.pipeline_mode<synchronous>, transform_indices = @transform_1, window_bounds = array<i64: 128, 128>}, {pipeline_mode = #tpu.pipeline_mode<synchronous>, transform_indices = @transform_2, window_bounds = array<i64: 1, 128>}, {pipeline_mode = #tpu.pipeline_mode<synchronous>, transform_indices = @transform_3, window_bounds = array<i64: 128, 128>}, {pipeline_mode = #tpu.pipeline_mode<synchronous>, transform_indices = @transform_4, window_bounds = array<i64: 1, 128>}, {pipeline_mode = #tpu.pipeline_mode<synchronous>, transform_indices = @transform_5, window_bounds = array<i64: 128, 128>}, {pipeline_mode = #tpu.pipeline_mode<synchronous>, transform_indices = @transform_6, window_bounds = array<i64: 1, 128>}, {transform_indices = @transform_7, window_bounds = array<i64: 16, 128>}]} {
    %c0 = arith.constant 0 : index
    %c0_0 = arith.constant 0 : index
    %0 = vector.load %arg1[%c0, %c0_0] : memref<16x128xbf16, #tpu.memory_space<vmem>>, vector<16x128xbf16>
    %c0_1 = arith.constant 0 : index
    %c0_2 = arith.constant 0 : index
    %1 = vector.load %arg2[%c0_1, %c0_2] : memref<128x128xbf16, #tpu.memory_space<vmem>>, vector<128x128xbf16>
    %cst = arith.constant dense<0.000000e+00> : vector<16x128xf32>
    %2 = tpu.matmul %0, %1, %cst {dimension_numbers = #tpu.dot_dimension_numbers<[1], [0], [0], [1], [0, 0, 1, 1], [], []>} : vector<16x128xbf16>, vector<128x128xbf16>, vector<16x128xf32> -> vector<16x128xf32>
    %c0_3 = arith.constant 0 : index
    %c0_4 = arith.constant 0 : index
    %3 = vector.load %arg3[%c0_3, %c0_4] : memref<1x128xf32, #tpu.memory_space<vmem>>, vector<1x128xf32>
    %4 = vector.broadcast %3 : vector<1x128xf32> to vector<16x128xf32>
    %5 = arith.addf %2, %4 : vector<16x128xf32>
    %cst_5 = arith.constant 0.000000e+00 : f32
    %6 = vector.broadcast %cst_5 : f32 to vector<16x128xf32>
    %7 = arith.maximumf %5, %6 : vector<16x128xf32>
    %8 = arith.truncf %7 : vector<16x128xf32> to vector<16x128xbf16>
    %c0_6 = arith.constant 0 : index
    %c0_7 = arith.constant 0 : index
    %9 = vector.load %arg4[%c0_6, %c0_7] : memref<128x128xbf16, #tpu.memory_space<vmem>>, vector<128x128xbf16>
    %cst_8 = arith.constant dense<0.000000e+00> : vector<16x128xf32>
    %10 = tpu.matmul %8, %9, %cst_8 {dimension_numbers = #tpu.dot_dimension_numbers<[1], [0], [0], [1], [0, 0, 1, 1], [], []>} : vector<16x128xbf16>, vector<128x128xbf16>, vector<16x128xf32> -> vector<16x128xf32>
    %c0_9 = arith.constant 0 : index
    %c0_10 = arith.constant 0 : index
    %11 = vector.load %arg5[%c0_9, %c0_10] : memref<1x128xf32, #tpu.memory_space<vmem>>, vector<1x128xf32>
    %12 = vector.broadcast %11 : vector<1x128xf32> to vector<16x128xf32>
    %13 = arith.addf %10, %12 : vector<16x128xf32>
    %cst_11 = arith.constant 0.000000e+00 : f32
    %14 = vector.broadcast %cst_11 : f32 to vector<16x128xf32>
    %15 = arith.maximumf %13, %14 : vector<16x128xf32>
    %16 = arith.truncf %15 : vector<16x128xf32> to vector<16x128xbf16>
    %c0_12 = arith.constant 0 : index
    %c0_13 = arith.constant 0 : index
    %17 = vector.load %arg6[%c0_12, %c0_13] : memref<128x128xbf16, #tpu.memory_space<vmem>>, vector<128x128xbf16>
    %cst_14 = arith.constant dense<0.000000e+00> : vector<16x128xf32>
    %18 = tpu.matmul %16, %17, %cst_14 {dimension_numbers = #tpu.dot_dimension_numbers<[1], [0], [0], [1], [0, 0, 1, 1], [], []>} : vector<16x128xbf16>, vector<128x128xbf16>, vector<16x128xf32> -> vector<16x128xf32>
    %c0_15 = arith.constant 0 : index
    %c0_16 = arith.constant 0 : index
    %19 = vector.load %arg7[%c0_15, %c0_16] : memref<1x128xf32, #tpu.memory_space<vmem>>, vector<1x128xf32>
    %20 = vector.broadcast %19 : vector<1x128xf32> to vector<16x128xf32>
    %21 = arith.addf %18, %20 : vector<16x128xf32>
    %22 = arith.truncf %21 : vector<16x128xf32> to vector<16x128xbf16>
    %c0_17 = arith.constant 0 : index
    %c0_18 = arith.constant 0 : index
    %23 = vector.load %arg8[%c0_17, %c0_18] : memref<16x128xbf16, #tpu.memory_space<vmem>>, vector<16x128xbf16>
    tpu.vector_store %arg8[%c0_17, %c0_18], %22 {strides = array<i32>} : memref<16x128xbf16, #tpu.memory_space<vmem>>, vector<16x128xbf16>,
    return
  }
  func.func @transform_0(%arg0: i32) -> (i32, i32) {
    %c0_i32 = arith.constant 0 : i32
    %c0_i32_0 = arith.constant 0 : i32
    return %arg0, %c0_i32 : i32, i32
  }
  func.func @transform_1(%arg0: i32) -> (i32, i32) {
    %c0_i32 = arith.constant 0 : i32
    %c0_i32_0 = arith.constant 0 : i32
    %c0_i32_1 = arith.constant 0 : i32
    return %c0_i32, %c0_i32_0 : i32, i32
  }
  func.func @transform_2(%arg0: i32) -> (i32, i32) {
    %c0_i32 = arith.constant 0 : i32
    %c0_i32_0 = arith.constant 0 : i32
    %c0_i32_1 = arith.constant 0 : i32
    return %c0_i32, %c0_i32_0 : i32, i32
  }
  func.func @transform_3(%arg0: i32) -> (i32, i32) {
    %c0_i32 = arith.constant 0 : i32
    %c0_i32_0 = arith.constant 0 : i32
    %c0_i32_1 = arith.constant 0 : i32
    return %c0_i32, %c0_i32_0 : i32, i32
  }
  func.func @transform_4(%arg0: i32) -> (i32, i32) {
    %c0_i32 = arith.constant 0 : i32
    %c0_i32_0 = arith.constant 0 : i32
    %c0_i32_1 = arith.constant 0 : i32
    return %c0_i32, %c0_i32_0 : i32, i32
  }
  func.func @transform_5(%arg0: i32) -> (i32, i32) {
    %c0_i32 = arith.constant 0 : i32
    %c0_i32_0 = arith.constant 0 : i32
    %c0_i32_1 = arith.constant 0 : i32
    return %c0_i32, %c0_i32_0 : i32, i32
  }
  func.func @transform_6(%arg0: i32) -> (i32, i32) {
    %c0_i32 = arith.constant 0 : i32
    %c0_i32_0 = arith.constant 0 : i32
    %c0_i32_1 = arith.constant 0 : i32
    return %c0_i32, %c0_i32_0 : i32, i32
  }
  func.func @transform_7(%arg0: i32) -> (i32, i32) {
    %c0_i32 = arith.constant 0 : i32
    %c0_i32_0 = arith.constant 0 : i32
    return %arg0, %c0_i32 : i32, i32
  }
}

</mosaic_0001>

<bundles_post_ra>
// kernel: _mlp_forward.1
= control target key start
LH: loop header
LB: loop body
LE: loop exit
PB: predicated region body
PF: predicated region fallthrough
CT: control target
= control target key end

     0   :  { %12 = vsyncpa [#allocation3], 0  ;;  %s663_s0 = inlined_call_operand.vmem [shape: bf16[8,128], index: 0, kind: input, shape index: {}]   ;;  %s664_s1 = inlined_call_operand.hbm [shape: bf16[128,128], index: 1, kind: input, shape index: {}]   ;;  %s665_s2 = inlined_call_operand.vmem [shape: f32[1,128], index: 2, kind: input, shape index: {}]   ;;  %s666_s3 = inlined_call_operand.hbm [shape: bf16[128,128], index: 3, kind: input, shape index: {}]   ;;  %s667_s4 = inlined_call_operand.vmem [shape: f32[1,128], index: 4, kind: input, shape index: {}]   ;;  %s668_s5 = inlined_call_operand.hbm [shape: bf16[128,128], index: 5, kind: input, shape index: {}]   ;;  %s669_s6 = inlined_call_operand.vmem [shape: f32[1,128], index: 6, kind: input, shape index: {}]   ;;  %s670_s7 = inlined_call_operand.vmem [shape: bf16[8,128], index: 7, kind: output, shape index: {}]  }
   0x1   :  { %13 = vsyncpa [#allocation5], 0  ;;  %s35_s26 = sshll.u32 %s666_s3, 4  ;;  %s594_s27 = smov [#allocation4]   ;;  %s36_s26 = int_to_ptr.hbm [resolvable:$true] %s35_s26 }
   0x2   :  { %s37_s28 = sshll.u32 %s594_s27, 4  ;;  %s20_s8 = sshll.u32 %s664_s1, 4  ;;  %s38_s28 = int_to_ptr.vmem [resolvable:$true] %s37_s28  ;;  %s21_s8 = int_to_ptr.hbm [resolvable:$true] %s20_s8 }
   0x3   :  { %s595_s9 = smov 64   ;;  %s596_s10 = smov 4  }
   0x4   :  { %43 = dma.hbm_to_vmem [thread:$0]  %s36_s26, 1024, %s38_s28, [#allocation5], %s595_s9, %s595_s9, %s596_s10  }
   0x5   :  { %s597_s11 = smov [#allocation2]   ;;  %s50_s15 = sshll.u32 %s668_s5, 4  ;;  %s51_s15 = int_to_ptr.hbm [resolvable:$true] %s50_s15 }
   0x6   :  { %s22_s12 = sshll.u32 %s597_s11, 4  ;;  %s598_s3 = smov [#allocation6]   ;;  %s23_s12 = int_to_ptr.vmem [resolvable:$true] %s22_s12 }
   0x7   :  { %28 = dma.hbm_to_vmem [thread:$0]  %s21_s8, 1024, %s23_s12, [#allocation3], %s595_s9, %s595_s9, %s596_s10  }
   0x8   :  { %s52_s16 = sshll.u32 %s598_s3, 4  ;;  %s53_s16 = int_to_ptr.vmem [resolvable:$true] %s52_s16 }
   0x9   :  { %58 = dma.hbm_to_vmem [thread:$0]  %s51_s15, 1024, %s53_s16, [#allocation5], %s595_s9, %s595_s9, %s596_s10  }
   0xa   :  { %590 = dma.done.wait [#allocation3], 1024  }
   0xb   :  { %591 = vsyncadd [#allocation3], 4294966272 }
   0xc   :  { %592 = dma.done.wait [#allocation5], 2048  }
   0xd   :  { %593 = vsyncadd [#allocation5], 4294965248  ;;  %v488_v0 = vld [vmem:[#allocation2 + $0x38] sm:$0xff]  ;;  %v487_v1 = vld [vmem:[#allocation2 + $0x30] sm:$0xff] }
   0xe   :  { %149 = vmatpush.bf16.msra.mxu0 %v488_v0  ;;  %v496_v2 = vld [vmem:[#allocation4 + $0x38] sm:$0xff]  ;;  %v495_v3 = vld [vmem:[#allocation4 + $0x30] sm:$0xff]  ;;  %v486_v4 = vld [vmem:[#allocation2 + $0x28] sm:$0xff] }
   0xf   :  { %234 = vmatpush.bf16.msra.mxu1 %v496_v2  ;;  %v494_v5 = vld [vmem:[#allocation4 + $0x28] sm:$0xff]  ;;  %v485_v6 = vld [vmem:[#allocation2 + $0x20] sm:$0xff]  ;;  %v484_v8 = vld [vmem:[#allocation2 + $0x18] sm:$0xff] }
  0x10   :  { %v493_v7 = vld [vmem:[#allocation4 + $0x20] sm:$0xff]  ;;  %v483_v9 = vld [vmem:[#allocation2 + $0x10] sm:$0xff]  ;;  %v482_v10 = vld [vmem:[#allocation2 + $0x8] sm:$0xff] }
  0x11   :  { %v481_v11 = vld [vmem:[#allocation2] sm:$0xff]  ;;  %v492_v13 = vld [vmem:[#allocation4 + $0x18] sm:$0xff]  ;;  %v491_v14 = vld [vmem:[#allocation4 + $0x10] sm:$0xff] }
  0x12   :  { %150 = vmatpush.bf16.msra.mxu0 %v487_v1  ;;  %v480_v12 = vld [vmem:[%s663_s0] sm:$0xff]  ;;  %v490_v15 = vld [vmem:[#allocation4 + $0x8] sm:$0xff]  ;;  %v504_v17 = vld [vmem:[#allocation6 + $0x38] sm:$0xff] }
  0x13   :  { %235 = vmatpush.bf16.msra.mxu1 %v495_v3  ;;  %v489_v16 = vld [vmem:[#allocation4] sm:$0xff]  ;;  %319 = vmatpush.bf16.msra.mxu2 %v504_v17  ;;  %v503_v18 = vld [vmem:[#allocation6 + $0x30] sm:$0xff]  ;;  %v502_v19 = vld [vmem:[#allocation6 + $0x28] sm:$0xff] }
  0x14   :  { %v501_v20 = vld [vmem:[#allocation6 + $0x20] sm:$0xff]  ;;  %v500_v29 = vld [vmem:[#allocation6 + $0x18] sm:$0xff]  ;;  %v499_v30 = vld [vmem:[#allocation6 + $0x10] sm:$0xff] }
  0x15   :  { %v515_v22 = vld [vmem:[%s665_s2] ss:$0 sm:$0xff]  ;;  %v498_v31 = vld [vmem:[#allocation6 + $0x8] sm:$0xff] }
  0x16   :  { %151 = vmatpush.bf16.msra.mxu0 %v486_v4  ;;  %v497_v32 = vld [vmem:[#allocation6] sm:$0xff] }
  0x17   :  { %236 = vmatpush.bf16.msra.mxu1 %v494_v5  ;;  %320 = vmatpush.bf16.msra.mxu2 %v503_v18  ;;  %v516_v34 = vld [vmem:[%s667_s4] ss:$0 sm:$0xff] }
  0x18   :  { %v517_v42 = vld [vmem:[%s669_s6] ss:$0 sm:$0xff] }
  0x1a   :  { %152 = vmatpush.bf16.msra.mxu0 %v485_v6 }
  0x1b   :  { %237 = vmatpush.bf16.msra.mxu1 %v493_v7  ;;  %321 = vmatpush.bf16.msra.mxu2 %v502_v19 }
  0x1e   :  { %153 = vmatpush.bf16.msra.mxu0 %v484_v8 }
  0x1f   :  { %238 = vmatpush.bf16.msra.mxu1 %v492_v13  ;;  %322 = vmatpush.bf16.msra.mxu2 %v501_v20 }
  0x22   :  { %154 = vmatpush.bf16.msra.mxu0 %v483_v9 }
  0x23   :  { %239 = vmatpush.bf16.msra.mxu1 %v491_v14  ;;  %323 = vmatpush.bf16.msra.mxu2 %v500_v29 }
  0x26   :  { %155 = vmatpush.bf16.msra.mxu0 %v482_v10 }
  0x27   :  { %240 = vmatpush.bf16.msra.mxu1 %v490_v15  ;;  %324 = vmatpush.bf16.msra.mxu2 %v499_v30 }
  0x2a   :  { %156 = vmatpush.bf16.msra.mxu0 %v481_v11 }
  0x2b   :  { %241 = vmatpush.bf16.msra.mxu1 %v489_v16  ;;  %325 = vmatpush.bf16.msra.mxu2 %v498_v31 }
  0x2d   :  { %157 = vmatmul.bf16.vlgmr.msra.gmra.mxu0 %v480_v12 }
  0x2f   :  { %326 = vmatpush.bf16.msra.mxu2 %v497_v32 }
  0xaa   :  { %v158_v21 = vpop.f32.mrf.mxu0 }
  0xab   :  { %v159_v23 = vadd.f32 %v515_v22, %v158_v21 }
  0xad   :  { %v163_v26 = vmax.f32 %v159_v23, 0.0 }
  0xb2   :  { %v160_v24 = vpop.f32.mrf.mxu0 }
  0xb3   :  { %v161_v25 = vadd.f32 %v515_v22, %v160_v24 }
  0xb5   :  { %v164_v27 = vmax.f32 %v161_v25, 0.0 }
  0xb7   :  { %v165_v28 = vpack.c.bf16 %v164_v27, %v163_v26 }
  0xb9   :  { %242 = vmatmul.bf16.vlgmr.msra.gmra.mxu1 %v165_v28 }
 0x136   :  { %v243_v33 = vpop.f32.mrf.mxu1 }
 0x137   :  { %v244_v35 = vadd.f32 %v516_v34, %v243_v33 }
 0x139   :  { %v248_v38 = vmax.f32 %v244_v35, 0.0 }
 0x13e   :  { %v245_v36 = vpop.f32.mrf.mxu1 }
 0x13f   :  { %v246_v37 = vadd.f32 %v516_v34, %v245_v36 }
 0x141   :  { %v249_v39 = vmax.f32 %v246_v37, 0.0 }
 0x143   :  { %v250_v40 = vpack.c.bf16 %v249_v39, %v248_v38 }
 0x145   :  { %327 = vmatmul.bf16.vlgmr.msra.gmra.mxu2 %v250_v40 }
 0x1c8   :  { %v328_v41 = vpop.f32.mrf.mxu2 }
 0x1c9   :  { %v329_v44 = vadd.f32 %v517_v42, %v328_v41 }
 0x1d0   :  { %v330_v43 = vpop.f32.mrf.mxu2 }
 0x1d1   :  { %v331_v45 = vadd.f32 %v517_v42, %v330_v43 }
 0x1d3   :  { %v508_v46 = vpack.c.bf16 %v331_v45, %v329_v44 }
 0x1d5   :  { %509 = vst [vmem:[#allocation7] sm:$0xff] %v508_v46  }
 0x1dc   :  { %v355_v47 = vld [vmem:[#allocation7] sm:$0xf] }
 0x1dd   :  { %356 = vst [vmem:[%s670_s7] sm:$0xf] %v355_v47 }
 0x1de   :  { %374 = vsyncpa [#allocation3], 1 }
 0x1df   :  { %375 = vsyncpa [#allocation5], 1 }

</bundles_post_ra>
